<compile_context>
chip_gen: v5e
topology: v5e:2x2
jax: 0.10.0
libtpu: 0.0.40
codegen_flags: <defaults>
</compile_context>

<pallas_src>
import functools

import jax
import jax.numpy as jnp
from jax.experimental import pallas as pl
from jax.experimental.pallas import tpu as pltpu


def _round_up(x: int, m: int) -> int:
    return ((x + m - 1) // m) * m


def _divisor_tile(dim: int, pref: int, floor: int) -> int:
    """Largest tile <= pref that divides dim (dim is a multiple of floor)."""
    t = pref
    while t > floor and dim % t != 0:
        t //= 2
    if dim % t != 0:
        t = floor
    return min(t, dim)


def _vmem_budget():
    """(vmem_limit_bytes, fused_gate_bytes) tuned per TPU generation."""
    cap = None
    try:
        cap = getattr(pltpu.get_tpu_info(), "vmem_capacity_bytes", None)
    except Exception:
        cap = None
    if cap is None:
        cap = 64 * 1024 * 1024            # conservative (v7x-class) default
    if cap <= 64 * 1024 * 1024:           # v7x: 64 MiB physical per TC
        limit = 48 * 1024 * 1024
    else:                                 # v5e / v6e: 128 MiB physical
        limit = 100 * 1024 * 1024
    gate = (limit * 3) // 4               # ~25% headroom for Mosaic scratch
    return limit, gate


# ---------------------------------------------------------------------------
# Fused whole-MLP kernel (all layers in one pallas_call, activations in VMEM)
# ---------------------------------------------------------------------------
def _fused_mlp_kernel(*refs, n_layers: int):
    x_ref = refs[0]
    w_refs = refs[1:1 + n_layers]
    b_refs = refs[1 + n_layers:1 + 2 * n_layers]
    o_ref = refs[1 + 2 * n_layers]

    h = x_ref[...]                       # (tm, K0_pad) in compute dtype
    for li in range(n_layers):
        # MXU matmul, f32 accumulation; bias/ReLU epilogue in f32 (v5e-safe).
        acc = jnp.dot(h, w_refs[li][...], preferred_element_type=jnp.float32)
        acc = acc + b_refs[li][...]      # (1, N_pad) broadcasts over rows
        if li < n_layers - 1:
            h = jnp.maximum(acc, 0.0).astype(h.dtype)   # back to MXU dtype
        else:
            o_ref[...] = acc.astype(o_ref.dtype)


def mlp_fused_pallas(x_p, weights_p, biases_p, *, tm: int, vmem_limit_bytes: int):
    """x_p: (Mp, K0p) compute-dtype, weights_p[l]: (Kp_l, Np_l), biases_p[l]: (1, Np_l) f32.

    All dims pre-padded: Mp % tm == 0, every feature dim % 128 == 0.
    Returns the full (Mp, Nout_p) f32 slab (lane-dense stores).
    """
    Mp, K0p = x_p.shape
    n_layers = len(weights_p)
    Nout_p = weights_p[-1].shape[1]
    kernel = functools.partial(_fused_mlp_kernel, n_layers=n_layers)

    def build_and_call(single_buffer_resident: bool):
        in_specs = [pl.BlockSpec((tm, K0p), lambda i: (i, 0))]
        for arr in list(weights_p) + list(biases_p):
            if single_buffer_resident:
                # constant index_map -> never re-fetched; one VMEM copy only.
                spec = pl.BlockSpec(arr.shape, lambda i: (0, 0),
                                    pipeline_mode=pl.Buffered(1))
            else:
                spec = pl.BlockSpec(arr.shape, lambda i: (0, 0))
            in_specs.append(spec)
        return pl.pallas_call(
            kernel,
            out_shape=jax.ShapeDtypeStruct((Mp, Nout_p), jnp.float32),
            grid=(Mp // tm,),
            in_specs=in_specs,
            out_specs=pl.BlockSpec((tm, Nout_p), lambda i: (i, 0)),
            compiler_params=pltpu.CompilerParams(
                # batch tiles are independent -> megacore-shardable on v7x
                dimension_semantics=("parallel",),
                vmem_limit_bytes=vmem_limit_bytes,
            ),
        )(x_p, *weights_p, *biases_p)

    try:
        return build_and_call(True)
    except Exception:
        # pipeline_mode=pl.Buffered(1) unsupported on this jax build.
        return build_and_call(False)


# ---------------------------------------------------------------------------
# Tiled single-Linear fallback (layers too large to keep fully resident)
# ---------------------------------------------------------------------------
def _tiled_linear_kernel(x_ref, w_ref, b_ref, o_ref, acc_ref, *, apply_relu: bool):
    k = pl.program_id(2)

    @pl.when(k == 0)
    def _():
        # fold bias into the accumulator instead of a separate full-tile add
        acc_ref[...] = jnp.broadcast_to(b_ref[...], acc_ref.shape)

    acc_ref[...] += jnp.dot(x_ref[...], w_ref[...],
                            preferred_element_type=jnp.float32)

    @pl.when(k == pl.num_programs(2) - 1)
    def _():
        y = acc_ref[...]
        if apply_relu:
            y = jnp.maximum(y, 0.0)
        o_ref[...] = y.astype(o_ref.dtype)


def linear_padded_pallas(x_p, w_p, b_p, *, apply_relu: bool, out_dtype,
                         tm: int = 256, tn: int = 512, tk: int = 1024,
                         vmem_limit_bytes: int = 48 * 1024 * 1024):
    """y_p = relu?(x_p @ w_p + b_p) on PRE-PADDED operands (no per-call pad/cast).

    x_p: (Mp, Kp), w_p: (Kp, Np), b_p: (1, Np) f32; Mp % 8 == 0, Kp/Np % 128 == 0.
    Returns the padded (Mp, Np) result (lane-dense output stores).
    """
    Mp, Kp = x_p.shape
    Kp2, Np = w_p.shape
    assert Kp == Kp2 and Mp % 8 == 0 and Kp % 128 == 0 and Np % 128 == 0
    tm = _divisor_tile(Mp, tm, 8)
    tk = _divisor_tile(Kp, tk, 128)
    tn = _divisor_tile(Np, tn, 128)

    return pl.pallas_call(
        functools.partial(_tiled_linear_kernel, apply_relu=apply_relu),
        out_shape=jax.ShapeDtypeStruct((Mp, Np), out_dtype),
        grid=(Mp // tm, Np // tn, Kp // tk),
        in_specs=[
            pl.BlockSpec((tm, tk), lambda i, j, k: (i, k)),
            pl.BlockSpec((tk, tn), lambda i, j, k: (k, j)),
            pl.BlockSpec((1, tn), lambda i, j, k: (0, j)),
        ],
        out_specs=pl.BlockSpec((tm, tn), lambda i, j, k: (i, j)),
        scratch_shapes=[pltpu.VMEM((tm, tn), jnp.float32)],
        compiler_params=pltpu.CompilerParams(
            dimension_semantics=("parallel", "parallel", "arbitrary"),
            vmem_limit_bytes=vmem_limit_bytes,
        ),
    )(x_p, w_p, b_p)


# ---------------------------------------------------------------------------
# Model
# ---------------------------------------------------------------------------
class Classifier:
    """JAX/Pallas port of the PyTorch Classifier MLP.

    `drop_out` / `activation` are accepted for signature parity but unused,
    matching the reference forward (no Dropout layer is ever appended; the
    activation is always ReLU).
    """

    def __init__(self, input_dim, output_dim, num_layers, num_hiddens,
                 drop_out=0.9, activation='relu', key=None,
                 compute_dtype=jnp.bfloat16):
        del drop_out, activation  # unused in the reference forward path
        if key is None:
            key = jax.random.PRNGKey(0)
        self.compute_dtype = compute_dtype
        self.output_dim = output_dim
        self.vmem_limit_bytes, self.fused_gate_bytes = _vmem_budget()

        if num_layers == 1:
            dims = [(input_dim, output_dim)]
        else:
            dims = [(input_dim, num_hiddens[0])]
            for i in range(1, num_layers - 1):
                dims.append((num_hiddens[i - 1], num_hiddens[i]))
            dims.append((num_hiddens[-1], output_dim))

        # torch-Linear-style uniform init, stored as (in, out) so the kernel
        # sees a lane-dense output dimension.
        self.params = []
        for (fan_in, fan_out) in dims:
            key, kw, kb = jax.random.split(key, 3)
            bound = 1.0 / float(fan_in) ** 0.5
            w = jax.random.uniform(kw, (fan_in, fan_out), jnp.float32,
                                   minval=-bound, maxval=bound)
            b = jax.random.uniform(kb, (fan_out,), jnp.float32,
                                   minval=-bound, maxval=bound)
            self.params.append((w, b))

        # Pad once (feature dims -> multiples of 128, lane-dense) and cast to
        # the MXU compute dtype at init; reused by BOTH the fused path and the
        # per-layer tiled fallback (no per-call pad/cast HBM passes).
        self.padded_w = []
        self.padded_b = []
        for (w, b) in self.params:
            kin, kout = w.shape
            kp, np_ = _round_up(kin, 128), _round_up(kout, 128)
            wp = jnp.zeros((kp, np_), compute_dtype)
            wp = wp.at[:kin, :kout].set(w.astype(compute_dtype))
            bp = jnp.zeros((1, np_), jnp.float32).at[0, :kout].set(b)
            self.padded_w.append(wp)
            self.padded_b.append(bp)
        self._max_np = max(w.shape[1] for w in self.padded_w)

    # rough VMEM footprint of the fused kernel (weights single-buffered)
    def _fused_vmem_bytes(self, tm):
        isz = jnp.dtype(self.compute_dtype).itemsize
        total = 0
        for wp, bp in zip(self.padded_w, self.padded_b):
            total += wp.size * isz + bp.size * 4       # Buffered(1) residents
        k0p = self.padded_w[0].shape[0]
        noutp = self.padded_w[-1].shape[1]
        total += tm * k0p * isz * 2                    # x block (double-buffered)
        total += tm * noutp * 4 * 2                    # out block (double-buffered)
        total += tm * self._max_np * 4 * 3             # in-flight f32 activations
        return total

    def _choose_tm(self, M):
        Mp8 = _round_up(M, 8)
        if Mp8 <= 128:
            return Mp8
        if Mp8 < 256:
            # 2 tiles so the "parallel" axis can shard over v7x's 2 TensorCores
            return _round_up((Mp8 + 1) // 2, 8)
        # Large batches: bigger tiles amortize per-grid-step overhead, but keep
        # the per-layer f32 activation slab <= ~2 MiB to avoid spills on wide
        # hidden layers, ensure >= 2 batch tiles, and respect the fused gate.
        for tm in (512, 256, 128):
            if (Mp8 >= 2 * tm
                    and tm * self._max_np * 4 <= 2 * 1024 * 1024
                    and self._fused_vmem_bytes(tm) <= self.fused_gate_bytes):
                return tm
        return 128

    def _forward_fallback(self, x):
        """Per-layer tiled kernels; activations stay padded between layers."""
        if x.ndim == 4:
            x = x.reshape(x.shape[0], -1)
        M, K0 = x.shape
        K0p = self.padded_w[0].shape[0]

        Mp8 = _round_up(M, 8)
        if Mp8 <= 256:
            Mp, tm_pref = Mp8, Mp8
        else:
            Mp = _round_up(M, 256)
            tm_pref = 512 if (Mp % 512 == 0 and Mp >= 1024) else 256

        hp = jnp.pad(x.astype(self.compute_dtype),
                     ((0, Mp - M), (0, K0p - K0)))
        n_layers = len(self.padded_w)
        for li, (wp, bp) in enumerate(zip(self.padded_w, self.padded_b)):
            last = li == n_layers - 1
            hp = linear_padded_pallas(
                hp, wp, bp, apply_relu=not last,
                out_dtype=jnp.float32 if last else self.compute_dtype,
                tm=tm_pref, tn=512, tk=1024,
                vmem_limit_bytes=self.vmem_limit_bytes)
        # single slice at the very end (padded rows/cols carry no real data)
        return hp[:M, :self.output_dim]

    def __call__(self, x):
        # torch.flatten(x, 1) equivalent for 4D NCHW input
        if x.ndim == 4:
            x = x.reshape(x.shape[0], -1)
        M, K0 = x.shape
        K0p = self.padded_w[0].shape[0]

        tm = self._choose_tm(M)
        Mp = _round_up(M, tm)

        if self._fused_vmem_bytes(tm) <= self.fused_gate_bytes:
            # --- fused path: single pallas_call for the whole MLP ---
            xp = jnp.pad(x.astype(self.compute_dtype),
                         ((0, Mp - M), (0, K0p - K0)))
            out_p = mlp_fused_pallas(xp, self.padded_w, self.padded_b, tm=tm,
                                     vmem_limit_bytes=self.vmem_limit_bytes)
            return out_p[:M, :self.output_dim]

        # --- fallback: one tiled kernel per layer (non-toy layer sizes) ---
        return self._forward_fallback(x)


if __name__ == "__main__":
    key = jax.random.PRNGKey(0)
    k_in, k_params, k_big, k_t, k_w, k_b = jax.random.split(key, 6)

    # Small shapes consistent with the module's forward:
    # x is a 4D NCHW tensor -> flattened to (batch, C*H*W)
    batch, C, H, W = 2, 4, 16, 16
    input_dim = C * H * W                # 1024
    output_dim = 10
    num_layers = 3
    num_hiddens = [32, 32]

    x = jax.random.normal(k_in, (batch, C, H, W), jnp.float32)

    model = Classifier(input_dim, output_dim, num_layers, num_hiddens,
                       key=k_params)

    def reference(xin):
        h = xin.reshape(xin.shape[0], -1)
        for li, (w, b) in enumerate(model.params):
            h = jnp.dot(h.astype(model.compute_dtype),
                        w.astype(model.compute_dtype),
                        preferred_element_type=jnp.float32) + b
            if li < len(model.params) - 1:
                h = jnp.maximum(h, 0.0)
        return h

    # Fused path, small batch.
    out = jax.block_until_ready(model(x))
    assert out.shape == (batch, output_dim)
    assert jnp.allclose(out, reference(x), atol=1e-2, rtol=1e-2)

    # Per-layer tiled fallback path on the same inputs (same numerics).
    out_fb = jax.block_until_ready(model._forward_fallback(x))
    assert out_fb.shape == (batch, output_dim)
    assert jnp.allclose(out_fb, reference(x), atol=1e-2, rtol=1e-2)

    # Medium batch: padded batch >= 256 -> >= 2 batch tiles (v7x megacore).
    xb = jax.random.normal(k_big, (256, C, H, W), jnp.float32)
    out_b = jax.block_until_ready(model(xb))
    assert out_b.shape == (256, output_dim)
    assert jnp.allclose(out_b, reference(xb), atol=1e-2, rtol=1e-2)

    # Standalone tiled-Linear check at a non-toy, tile-exercising size.
    Mt, Kt, Nt = 256, 1024, 512
    xt = jax.random.normal(k_t, (Mt, Kt), jnp.float32).astype(jnp.bfloat16)
    wt = (0.05 * jax.random.normal(k_w, (Kt, Nt), jnp.float32)).astype(jnp.bfloat16)
    bt = (0.1 * jax.random.normal(k_b, (Nt,), jnp.float32)).reshape(1, -1)
    yt = jax.block_until_ready(
        linear_padded_pallas(xt, wt, bt, apply_relu=True, out_dtype=jnp.float32,
                             tm=256, tn=512, tk=1024))
    yt_ref = jnp.maximum(
        jnp.dot(xt, wt, preferred_element_type=jnp.float32) + bt, 0.0)
    assert jnp.allclose(yt, yt_ref, atol=2e-2, rtol=2e-2)

    print("KERNEL_OK")
</pallas_src>

<mosaic_0001>
module attributes {stable_mosaic.version = 11 : i64} {
  func.func @_fused_mlp_kernel(%arg0: i32, %arg1: memref<8x1024xbf16, #tpu.memory_space<vmem>>, %arg2: memref<1024x128xbf16, #tpu.memory_space<vmem>>, %arg3: memref<128x128xbf16, #tpu.memory_space<vmem>>, %arg4: memref<128x128xbf16, #tpu.memory_space<vmem>>, %arg5: memref<1x128xf32, #tpu.memory_space<vmem>>, %arg6: memref<1x128xf32, #tpu.memory_space<vmem>>, %arg7: memref<1x128xf32, #tpu.memory_space<vmem>>, %arg8: memref<8x128xf32, #tpu.memory_space<vmem>>) attributes {dimension_semantics = [#tpu.dimension_semantics<parallel>], iteration_bounds = array<i64: 1>, scalar_prefetch = 0 : i64, scratch_operands = 0 : i64, tpu.core_type = #tpu.core_type<tc>, window_params = [{transform_indices = @transform_0, window_bounds = array<i64: 8, 1024>}, {pipeline_mode = #tpu.pipeline_mode<synchronous>, transform_indices = @transform_1, window_bounds = array<i64: 1024, 128>}, {pipeline_mode = #tpu.pipeline_mode<synchronous>, transform_indices = @transform_2, window_bounds = array<i64: 128, 128>}, {pipeline_mode = #tpu.pipeline_mode<synchronous>, transform_indices = @transform_3, window_bounds = array<i64: 128, 128>}, {pipeline_mode = #tpu.pipeline_mode<synchronous>, transform_indices = @transform_4, window_bounds = array<i64: 1, 128>}, {pipeline_mode = #tpu.pipeline_mode<synchronous>, transform_indices = @transform_5, window_bounds = array<i64: 1, 128>}, {pipeline_mode = #tpu.pipeline_mode<synchronous>, transform_indices = @transform_6, window_bounds = array<i64: 1, 128>}, {transform_indices = @transform_7, window_bounds = array<i64: 8, 128>}]} {
    %c0 = arith.constant 0 : index
    %c0_0 = arith.constant 0 : index
    %0 = vector.load %arg1[%c0, %c0_0] : memref<8x1024xbf16, #tpu.memory_space<vmem>>, vector<8x1024xbf16>
    %c0_1 = arith.constant 0 : index
    %c0_2 = arith.constant 0 : index
    %1 = vector.load %arg2[%c0_1, %c0_2] : memref<1024x128xbf16, #tpu.memory_space<vmem>>, vector<1024x128xbf16>
    %cst = arith.constant dense<0.000000e+00> : vector<8x128xf32>
    %2 = tpu.matmul %0, %1, %cst {dimension_numbers = #tpu.dot_dimension_numbers<[1], [0], [0], [1], [0, 0, 1, 1], [], []>} : vector<8x1024xbf16>, vector<1024x128xbf16>, vector<8x128xf32> -> vector<8x128xf32>
    %c0_3 = arith.constant 0 : index
    %c0_4 = arith.constant 0 : index
    %3 = vector.load %arg5[%c0_3, %c0_4] : memref<1x128xf32, #tpu.memory_space<vmem>>, vector<1x128xf32>
    %4 = vector.broadcast %3 : vector<1x128xf32> to vector<8x128xf32>
    %5 = arith.addf %2, %4 : vector<8x128xf32>
    %cst_5 = arith.constant 0.000000e+00 : f32
    %6 = vector.broadcast %cst_5 : f32 to vector<8x128xf32>
    %7 = arith.maximumf %5, %6 : vector<8x128xf32>
    %8 = arith.truncf %7 : vector<8x128xf32> to vector<8x128xbf16>
    %c0_6 = arith.constant 0 : index
    %c0_7 = arith.constant 0 : index
    %9 = vector.load %arg3[%c0_6, %c0_7] : memref<128x128xbf16, #tpu.memory_space<vmem>>, vector<128x128xbf16>
    %cst_8 = arith.constant dense<0.000000e+00> : vector<8x128xf32>
    %10 = tpu.matmul %8, %9, %cst_8 {dimension_numbers = #tpu.dot_dimension_numbers<[1], [0], [0], [1], [0, 0, 1, 1], [], []>} : vector<8x128xbf16>, vector<128x128xbf16>, vector<8x128xf32> -> vector<8x128xf32>
    %c0_9 = arith.constant 0 : index
    %c0_10 = arith.constant 0 : index
    %11 = vector.load %arg6[%c0_9, %c0_10] : memref<1x128xf32, #tpu.memory_space<vmem>>, vector<1x128xf32>
    %12 = vector.broadcast %11 : vector<1x128xf32> to vector<8x128xf32>
    %13 = arith.addf %10, %12 : vector<8x128xf32>
    %cst_11 = arith.constant 0.000000e+00 : f32
    %14 = vector.broadcast %cst_11 : f32 to vector<8x128xf32>
    %15 = arith.maximumf %13, %14 : vector<8x128xf32>
    %16 = arith.truncf %15 : vector<8x128xf32> to vector<8x128xbf16>
    %c0_12 = arith.constant 0 : index
    %c0_13 = arith.constant 0 : index
    %17 = vector.load %arg4[%c0_12, %c0_13] : memref<128x128xbf16, #tpu.memory_space<vmem>>, vector<128x128xbf16>
    %cst_14 = arith.constant dense<0.000000e+00> : vector<8x128xf32>
    %18 = tpu.matmul %16, %17, %cst_14 {dimension_numbers = #tpu.dot_dimension_numbers<[1], [0], [0], [1], [0, 0, 1, 1], [], []>} : vector<8x128xbf16>, vector<128x128xbf16>, vector<8x128xf32> -> vector<8x128xf32>
    %c0_15 = arith.constant 0 : index
    %c0_16 = arith.constant 0 : index
    %19 = vector.load %arg7[%c0_15, %c0_16] : memref<1x128xf32, #tpu.memory_space<vmem>>, vector<1x128xf32>
    %20 = vector.broadcast %19 : vector<1x128xf32> to vector<8x128xf32>
    %21 = arith.addf %18, %20 : vector<8x128xf32>
    %c0_17 = arith.constant 0 : index
    %c0_18 = arith.constant 0 : index
    %22 = vector.load %arg8[%c0_17, %c0_18] : memref<8x128xf32, #tpu.memory_space<vmem>>, vector<8x128xf32>
    tpu.vector_store %arg8[%c0_17, %c0_18], %21 {strides = array<i32>} : memref<8x128xf32, #tpu.memory_space<vmem>>, vector<8x128xf32>,
    return
  }
  func.func @transform_0(%arg0: i32) -> (i32, i32) {
    %c0_i32 = arith.constant 0 : i32
    %c0_i32_0 = arith.constant 0 : i32
    return %arg0, %c0_i32 : i32, i32
  }
  func.func @transform_1(%arg0: i32) -> (i32, i32) {
    %c0_i32 = arith.constant 0 : i32
    %c0_i32_0 = arith.constant 0 : i32
    %c0_i32_1 = arith.constant 0 : i32
    return %c0_i32, %c0_i32_0 : i32, i32
  }
  func.func @transform_2(%arg0: i32) -> (i32, i32) {
    %c0_i32 = arith.constant 0 : i32
    %c0_i32_0 = arith.constant 0 : i32
    %c0_i32_1 = arith.constant 0 : i32
    return %c0_i32, %c0_i32_0 : i32, i32
  }
  func.func @transform_3(%arg0: i32) -> (i32, i32) {
    %c0_i32 = arith.constant 0 : i32
    %c0_i32_0 = arith.constant 0 : i32
    %c0_i32_1 = arith.constant 0 : i32
    return %c0_i32, %c0_i32_0 : i32, i32
  }
  func.func @transform_4(%arg0: i32) -> (i32, i32) {
    %c0_i32 = arith.constant 0 : i32
    %c0_i32_0 = arith.constant 0 : i32
    %c0_i32_1 = arith.constant 0 : i32
    return %c0_i32, %c0_i32_0 : i32, i32
  }
  func.func @transform_5(%arg0: i32) -> (i32, i32) {
    %c0_i32 = arith.constant 0 : i32
    %c0_i32_0 = arith.constant 0 : i32
    %c0_i32_1 = arith.constant 0 : i32
    return %c0_i32, %c0_i32_0 : i32, i32
  }
  func.func @transform_6(%arg0: i32) -> (i32, i32) {
    %c0_i32 = arith.constant 0 : i32
    %c0_i32_0 = arith.constant 0 : i32
    %c0_i32_1 = arith.constant 0 : i32
    return %c0_i32, %c0_i32_0 : i32, i32
  }
  func.func @transform_7(%arg0: i32) -> (i32, i32) {
    %c0_i32 = arith.constant 0 : i32
    %c0_i32_0 = arith.constant 0 : i32
    return %arg0, %c0_i32 : i32, i32
  }
}

module attributes {stable_mosaic.version = 11 : i64} {
  func.func @_fused_mlp_kernel(%arg0: i32, %arg1: memref<8x1024xbf16, #tpu.memory_space<vmem>>, %arg2: memref<1024x128xbf16, #tpu.memory_space<vmem>>, %arg3: memref<128x128xbf16, #tpu.memory_space<vmem>>, %arg4: memref<128x128xbf16, #tpu.memory_space<vmem>>, %arg5: memref<1x128xf32, #tpu.memory_space<vmem>>, %arg6: memref<1x128xf32, #tpu.memory_space<vmem>>, %arg7: memref<1x128xf32, #tpu.memory_space<vmem>>, %arg8: memref<8x128xf32, #tpu.memory_space<vmem>>) attributes {dimension_semantics = [#tpu.dimension_semantics<parallel>], iteration_bounds = array<i64: 1>, scalar_prefetch = 0 : i64, scratch_operands = 0 : i64, tpu.core_type = #tpu.core_type<tc>, window_params = [{transform_indices = @transform_0, window_bounds = array<i64: 8, 1024>}, {pipeline_mode = #tpu.pipeline_mode<synchronous>, transform_indices = @transform_1, window_bounds = array<i64: 1024, 128>}, {pipeline_mode = #tpu.pipeline_mode<synchronous>, transform_indices = @transform_2, window_bounds = array<i64: 128, 128>}, {pipeline_mode = #tpu.pipeline_mode<synchronous>, transform_indices = @transform_3, window_bounds = array<i64: 128, 128>}, {pipeline_mode = #tpu.pipeline_mode<synchronous>, transform_indices = @transform_4, window_bounds = array<i64: 1, 128>}, {pipeline_mode = #tpu.pipeline_mode<synchronous>, transform_indices = @transform_5, window_bounds = array<i64: 1, 128>}, {pipeline_mode = #tpu.pipeline_mode<synchronous>, transform_indices = @transform_6, window_bounds = array<i64: 1, 128>}, {transform_indices = @transform_7, window_bounds = array<i64: 8, 128>}]} {
    %c0 = arith.constant 0 : index
    %c0_0 = arith.constant 0 : index
    %0 = vector.load %arg1[%c0, %c0_0] : memref<8x1024xbf16, #tpu.memory_space<vmem>>, vector<8x1024xbf16>
    %c0_1 = arith.constant 0 : index
    %c0_2 = arith.constant 0 : index
    %1 = vector.load %arg2[%c0_1, %c0_2] : memref<1024x128xbf16, #tpu.memory_space<vmem>>, vector<1024x128xbf16>
    %cst = arith.constant dense<0.000000e+00> : vector<8x128xf32>
    %2 = tpu.matmul %0, %1, %cst {dimension_numbers = #tpu.dot_dimension_numbers<[1], [0], [0], [1], [0, 0, 1, 1], [], []>} : vector<8x1024xbf16>, vector<1024x128xbf16>, vector<8x128xf32> -> vector<8x128xf32>
    %c0_3 = arith.constant 0 : index
    %c0_4 = arith.constant 0 : index
    %3 = vector.load %arg5[%c0_3, %c0_4] : memref<1x128xf32, #tpu.memory_space<vmem>>, vector<1x128xf32>
    %4 = vector.broadcast %3 : vector<1x128xf32> to vector<8x128xf32>
    %5 = arith.addf %2, %4 : vector<8x128xf32>
    %cst_5 = arith.constant 0.000000e+00 : f32
    %6 = vector.broadcast %cst_5 : f32 to vector<8x128xf32>
    %7 = arith.maximumf %5, %6 : vector<8x128xf32>
    %8 = arith.truncf %7 : vector<8x128xf32> to vector<8x128xbf16>
    %c0_6 = arith.constant 0 : index
    %c0_7 = arith.constant 0 : index
    %9 = vector.load %arg3[%c0_6, %c0_7] : memref<128x128xbf16, #tpu.memory_space<vmem>>, vector<128x128xbf16>
    %cst_8 = arith.constant dense<0.000000e+00> : vector<8x128xf32>
    %10 = tpu.matmul %8, %9, %cst_8 {dimension_numbers = #tpu.dot_dimension_numbers<[1], [0], [0], [1], [0, 0, 1, 1], [], []>} : vector<8x128xbf16>, vector<128x128xbf16>, vector<8x128xf32> -> vector<8x128xf32>
    %c0_9 = arith.constant 0 : index
    %c0_10 = arith.constant 0 : index
    %11 = vector.load %arg6[%c0_9, %c0_10] : memref<1x128xf32, #tpu.memory_space<vmem>>, vector<1x128xf32>
    %12 = vector.broadcast %11 : vector<1x128xf32> to vector<8x128xf32>
    %13 = arith.addf %10, %12 : vector<8x128xf32>
    %cst_11 = arith.constant 0.000000e+00 : f32
    %14 = vector.broadcast %cst_11 : f32 to vector<8x128xf32>
    %15 = arith.maximumf %13, %14 : vector<8x128xf32>
    %16 = arith.truncf %15 : vector<8x128xf32> to vector<8x128xbf16>
    %c0_12 = arith.constant 0 : index
    %c0_13 = arith.constant 0 : index
    %17 = vector.load %arg4[%c0_12, %c0_13] : memref<128x128xbf16, #tpu.memory_space<vmem>>, vector<128x128xbf16>
    %cst_14 = arith.constant dense<0.000000e+00> : vector<8x128xf32>
    %18 = tpu.matmul %16, %17, %cst_14 {dimension_numbers = #tpu.dot_dimension_numbers<[1], [0], [0], [1], [0, 0, 1, 1], [], []>} : vector<8x128xbf16>, vector<128x128xbf16>, vector<8x128xf32> -> vector<8x128xf32>
    %c0_15 = arith.constant 0 : index
    %c0_16 = arith.constant 0 : index
    %19 = vector.load %arg7[%c0_15, %c0_16] : memref<1x128xf32, #tpu.memory_space<vmem>>, vector<1x128xf32>
    %20 = vector.broadcast %19 : vector<1x128xf32> to vector<8x128xf32>
    %21 = arith.addf %18, %20 : vector<8x128xf32>
    %c0_17 = arith.constant 0 : index
    %c0_18 = arith.constant 0 : index
    %22 = vector.load %arg8[%c0_17, %c0_18] : memref<8x128xf32, #tpu.memory_space<vmem>>, vector<8x128xf32>
    tpu.vector_store %arg8[%c0_17, %c0_18], %21 {strides = array<i32>} : memref<8x128xf32, #tpu.memory_space<vmem>>, vector<8x128xf32>,
    return
  }
  func.func @transform_0(%arg0: i32) -> (i32, i32) {
    %c0_i32 = arith.constant 0 : i32
    %c0_i32_0 = arith.constant 0 : i32
    return %arg0, %c0_i32 : i32, i32
  }
  func.func @transform_1(%arg0: i32) -> (i32, i32) {
    %c0_i32 = arith.constant 0 : i32
    %c0_i32_0 = arith.constant 0 : i32
    %c0_i32_1 = arith.constant 0 : i32
    return %c0_i32, %c0_i32_0 : i32, i32
  }
  func.func @transform_2(%arg0: i32) -> (i32, i32) {
    %c0_i32 = arith.constant 0 : i32
    %c0_i32_0 = arith.constant 0 : i32
    %c0_i32_1 = arith.constant 0 : i32
    return %c0_i32, %c0_i32_0 : i32, i32
  }
  func.func @transform_3(%arg0: i32) -> (i32, i32) {
    %c0_i32 = arith.constant 0 : i32
    %c0_i32_0 = arith.constant 0 : i32
    %c0_i32_1 = arith.constant 0 : i32
    return %c0_i32, %c0_i32_0 : i32, i32
  }
  func.func @transform_4(%arg0: i32) -> (i32, i32) {
    %c0_i32 = arith.constant 0 : i32
    %c0_i32_0 = arith.constant 0 : i32
    %c0_i32_1 = arith.constant 0 : i32
    return %c0_i32, %c0_i32_0 : i32, i32
  }
  func.func @transform_5(%arg0: i32) -> (i32, i32) {
    %c0_i32 = arith.constant 0 : i32
    %c0_i32_0 = arith.constant 0 : i32
    %c0_i32_1 = arith.constant 0 : i32
    return %c0_i32, %c0_i32_0 : i32, i32
  }
  func.func @transform_6(%arg0: i32) -> (i32, i32) {
    %c0_i32 = arith.constant 0 : i32
    %c0_i32_0 = arith.constant 0 : i32
    %c0_i32_1 = arith.constant 0 : i32
    return %c0_i32, %c0_i32_0 : i32, i32
  }
  func.func @transform_7(%arg0: i32) -> (i32, i32) {
    %c0_i32 = arith.constant 0 : i32
    %c0_i32_0 = arith.constant 0 : i32
    return %arg0, %c0_i32 : i32, i32
  }
}

</mosaic_0001>

<bundles_post_ra>
// kernel: tpu_custom_call.1
= control target key start
LH: loop header
LB: loop body
LE: loop exit
PB: predicated region body
PF: predicated region fallthrough
CT: control target
= control target key end

     0   :  { %12 = vsyncpa [#allocation3], 0  ;;  %s1535_s0 = inlined_call_operand.hbm [shape: bf16[8,1024], index: 0, kind: input, shape index: {}]   ;;  %s1536_s1 = inlined_call_operand.hbm [shape: bf16[1024,128], index: 1, kind: input, shape index: {}]   ;;  %s1537_s2 = inlined_call_operand.hbm [shape: bf16[128,128], index: 2, kind: input, shape index: {}]   ;;  %s1538_s3 = inlined_call_operand.hbm [shape: bf16[128,128], index: 3, kind: input, shape index: {}]   ;;  %s1539_s4 = inlined_call_operand.vmem [shape: f32[1,128], index: 4, kind: input, shape index: {}]   ;;  %s1540_s5 = inlined_call_operand.vmem [shape: f32[1,128], index: 5, kind: input, shape index: {}]   ;;  %s1541_s6 = inlined_call_operand.vmem [shape: f32[1,128], index: 6, kind: input, shape index: {}]   ;;  %s1542_s7 = inlined_call_operand.hbm [shape: f32[8,128], index: 7, kind: output, shape index: {}]  }
   0x1   :  { %13 = vsyncpa [#allocation6], 0 }
   0x2   :  { %14 = vsyncpa [#allocation9], 0  ;;  %s31_s26 = sshll.u32 %s1536_s1, 4  ;;  %s32_s26 = int_to_ptr.hbm [resolvable:$true] %s31_s26 }
   0x3   :  { %15 = vsyncpa [#allocation4], 0  ;;  %s1464_s27 = smov [#allocation5]   ;;  %s21_s8 = sshll.u32 %s1535_s0, 4  ;;  %s22_s8 = int_to_ptr.hbm [resolvable:$true] %s21_s8 }
   0x4   :  { %s33_s28 = sshll.u32 %s1464_s27, 4  ;;  %s1465_s9 = smov 64   ;;  %s34_s28 = int_to_ptr.vmem [resolvable:$true] %s33_s28 }
   0x5   :  { %s1466_s10 = smov 4   ;;  %s1467_s11 = smov [#allocation2]  }
   0x6   :  { %39 = dma.hbm_to_vmem [thread:$0]  %s32_s26, 8192, %s34_s28, [#allocation6], %s1465_s9, %s1465_s9, %s1466_s10  }
   0x7   :  { %s23_s12 = sshll.u32 %s1467_s11, 4  ;;  %s44_s15 = sshll.u32 %s1537_s2, 4  ;;  %s24_s12 = int_to_ptr.vmem [resolvable:$true] %s23_s12  ;;  %s45_s15 = int_to_ptr.hbm [resolvable:$true] %s44_s15 }
   0x8   :  { %26 = dma.hbm_to_vmem [thread:$0]  %s22_s8, 512, %s24_s12, [#allocation3]  }
   0x9   :  { %s57_s17 = sshll.u32 %s1538_s3, 4  ;;  %s1468_s18 = smov [#allocation7]   ;;  %s58_s17 = int_to_ptr.hbm [resolvable:$true] %s57_s17 }
   0xa   :  { %s46_s19 = sshll.u32 %s1468_s18, 4  ;;  %s1469_s0 = smov [#allocation8]   ;;  %s47_s19 = int_to_ptr.vmem [resolvable:$true] %s46_s19 }
   0xb   :  { %52 = dma.hbm_to_vmem [thread:$0]  %s45_s15, 1024, %s47_s19, [#allocation6], %s1465_s9, %s1465_s9, %s1466_s10  }
   0xc   :  { %s59_s20 = sshll.u32 %s1469_s0, 4  ;;  %s60_s20 = int_to_ptr.vmem [resolvable:$true] %s59_s20 }
   0xd   :  { %65 = dma.hbm_to_vmem [thread:$0]  %s58_s17, 1024, %s60_s20, [#allocation9], %s1465_s9, %s1465_s9, %s1466_s10  }
   0xe   :  { %1456 = dma.done.wait [#allocation3], 512  }
   0xf   :  { %1457 = vsyncadd [#allocation3], 4294966784 }
  0x10   :  { %1458 = dma.done.wait [#allocation6], 9216  }
  0x11   :  { %1459 = vsyncadd [#allocation6], 4294958080 }
  0x12   :  { %1460 = dma.done.wait [#allocation9], 1024  }
  0x13   :  { %1461 = vsyncadd [#allocation9], 4294966272  ;;  %v1253_v0 = vld [vmem:[#allocation5 + $0x38] sm:$0xff]  ;;  %v1252_v4 = vld [vmem:[#allocation5 + $0x30] sm:$0xff]  ;;  %s1470_s24 = smov [#allocation10]   ;;  %s914_s28 = sshll.u32 %s1542_s7, 4  ;;  %s915_s28 = int_to_ptr.hbm [resolvable:$true] %s914_s28 }
  0x14   :  { %v1261_v1 = vld [vmem:[#allocation5 + $0x78] sm:$0xff]  ;;  %636 = vmatpush.bf16.msra.mxu0 %v1253_v0  ;;  %v1260_v5 = vld [vmem:[#allocation5 + $0x70] sm:$0xff]  ;;  %v1251_v8 = vld [vmem:[#allocation5 + $0x28] sm:$0xff]  ;;  %s912_s25 = sshll.u32 %s1470_s24, 4  ;;  %s913_s25 = int_to_ptr.vmem [resolvable:$true] %s912_s25 }
  0x15   :  { %v1269_v2 = vld [vmem:[#allocation5 + $0xb8] sm:$0xff]  ;;  %649 = vmatpush.bf16.msra.mxu1 %v1261_v1  ;;  %v1268_v6 = vld [vmem:[#allocation5 + $0xb0] sm:$0xff]  ;;  %v1259_v9 = vld [vmem:[#allocation5 + $0x68] sm:$0xff] }
  0x16   :  { %v1277_v3 = vld [vmem:[#allocation5 + $0xf8] sm:$0xff]  ;;  %662 = vmatpush.bf16.msra.mxu2 %v1269_v2  ;;  %v1276_v7 = vld [vmem:[#allocation5 + $0xf0] sm:$0xff]  ;;  %v1267_v10 = vld [vmem:[#allocation5 + $0xa8] sm:$0xff] }
  0x17   :  { %675 = vmatpush.bf16.msra.mxu3 %v1277_v3  ;;  %v1275_v11 = vld [vmem:[#allocation5 + $0xe8] sm:$0xff]  ;;  %v1250_v12 = vld [vmem:[#allocation5 + $0x20] sm:$0xff]  ;;  %v1249_v16 = vld [vmem:[#allocation5 + $0x18] sm:$0xff] }
  0x18   :  { %637 = vmatpush.bf16.msra.mxu0 %v1252_v4  ;;  %v1258_v13 = vld [vmem:[#allocation5 + $0x60] sm:$0xff]  ;;  %v1257_v17 = vld [vmem:[#allocation5 + $0x58] sm:$0xff]  ;;  %v1248_v20 = vld [vmem:[#allocation5 + $0x10] sm:$0xff] }
  0x19   :  { %650 = vmatpush.bf16.msra.mxu1 %v1260_v5  ;;  %v1266_v14 = vld [vmem:[#allocation5 + $0xa0] sm:$0xff]  ;;  %v1265_v18 = vld [vmem:[#allocation5 + $0x98] sm:$0xff]  ;;  %v1256_v21 = vld [vmem:[#allocation5 + $0x50] sm:$0xff] }
  0x1a   :  { %663 = vmatpush.bf16.msra.mxu2 %v1268_v6  ;;  %v1274_v15 = vld [vmem:[#allocation5 + $0xe0] sm:$0xff]  ;;  %v1273_v19 = vld [vmem:[#allocation5 + $0xd8] sm:$0xff]  ;;  %v1264_v22 = vld [vmem:[#allocation5 + $0x90] sm:$0xff] }
  0x1b   :  { %676 = vmatpush.bf16.msra.mxu3 %v1276_v7  ;;  %v1272_v23 = vld [vmem:[#allocation5 + $0xd0] sm:$0xff]  ;;  %v1247_v24 = vld [vmem:[#allocation5 + $0x8] sm:$0xff]  ;;  %v88_v29 = vld [vmem:[#allocation2] sm:$0xff] }
  0x1c   :  { %638 = vmatpush.bf16.msra.mxu0 %v1251_v8  ;;  %v1255_v25 = vld [vmem:[#allocation5 + $0x48] sm:$0xff]  ;;  %v1246_v30 = vld [vmem:[#allocation5] sm:$0xff]  ;;  %v228_v33 = vunpack.c.l.b16 %v88_v29  ;;  %v229_v37 = vunpack.c.h.b16 %v88_v29  ;;  %v1285_v38 = vld [vmem:[#allocation5 + $0x138] sm:$0xff] }
  0x1d   :  { %651 = vmatpush.bf16.msra.mxu1 %v1259_v9  ;;  %v1263_v26 = vld [vmem:[#allocation5 + $0x88] sm:$0xff]  ;;  %v1254_v31 = vld [vmem:[#allocation5 + $0x40] sm:$0xff]  ;;  %v1293_v39 = vld [vmem:[#allocation5 + $0x178] sm:$0xff] }
  0x1e   :  { %664 = vmatpush.bf16.msra.mxu2 %v1267_v10  ;;  %v1271_v27 = vld [vmem:[#allocation5 + $0xc8] sm:$0xff]  ;;  %v1262_v34 = vld [vmem:[#allocation5 + $0x80] sm:$0xff]  ;;  %v1301_v40 = vld [vmem:[#allocation5 + $0x1b8] sm:$0xff]  ;;  %v236_v43 = vpack.c.b16 %v228_v33, %v228_v33  ;;  %v237_v45 = vpack.c.b16 %v229_v37, %v229_v37 }
  0x1f   :  { %677 = vmatpush.bf16.msra.mxu3 %v1275_v11  ;;  %v89_v28 = vld [vmem:[#allocation2 + $0x8] sm:$0xff]  ;;  %v1270_v35 = vld [vmem:[#allocation5 + $0xc0] sm:$0xff]  ;;  %v1309_v41 = vld [vmem:[#allocation5 + $0x1f8] sm:$0xff] }
  0x20   :  { %639 = vmatpush.bf16.msra.mxu0 %v1250_v12  ;;  %v230_v32 = vunpack.c.l.b16 %v89_v28  ;;  %v231_v36 = vunpack.c.h.b16 %v89_v28  ;;  %v1284_v46 = vld [vmem:[#allocation5 + $0x130] sm:$0xff]  ;;  %v1283_v50 = vld [vmem:[#allocation5 + $0x128] sm:$0xff]  ;;  %v1282_v54 = vld [vmem:[#allocation5 + $0x120] sm:$0xff] }
  0x21   :  { %652 = vmatpush.bf16.msra.mxu1 %v1258_v13  ;;  %v1292_v47 = vld [vmem:[#allocation5 + $0x170] sm:$0xff]  ;;  %v1291_v51 = vld [vmem:[#allocation5 + $0x168] sm:$0xff]  ;;  %v1290_v55 = vld [vmem:[#allocation5 + $0x160] sm:$0xff] }
  0x22   :  { %665 = vmatpush.bf16.msra.mxu2 %v1266_v14  ;;  %v238_v42 = vpack.c.b16 %v230_v32, %v230_v32  ;;  %v239_v44 = vpack.c.b16 %v231_v36, %v231_v36  ;;  %v1300_v48 = vld [vmem:[#allocation5 + $0x1b0] sm:$0xff]  ;;  %v1299_v52 = vld [vmem:[#allocation5 + $0x1a8] sm:$0xff]  ;;  %v1298_v56 = vld [vmem:[#allocation5 + $0x1a0] sm:$0xff] }
  0x23   :  { %678 = vmatpush.bf16.msra.mxu3 %v1274_v15  ;;  %v1308_v49 = vld [vmem:[#allocation5 + $0x1f0] sm:$0xff]  ;;  %v1307_v53 = vld [vmem:[#allocation5 + $0x1e8] sm:$0xff]  ;;  %v1306_v57 = vld [vmem:[#allocation5 + $0x1e0] sm:$0xff] }
  0x24   :  { %640 = vmatpush.bf16.msra.mxu0 %v1249_v16  ;;  %v1281_v58 = vld [vmem:[#allocation5 + $0x118] sm:$0xff]  ;;  %v1280_v62 = vld [vmem:[#allocation5 + $0x110] sm:$0xff]  ;;  %v1279_v2 = vld [vmem:[#allocation5 + $0x108] sm:$0xff] }
  0x25   :  { %653 = vmatpush.bf16.msra.mxu1 %v1257_v17  ;;  %v1289_v59 = vld [vmem:[#allocation5 + $0x158] sm:$0xff]  ;;  %v1288_v63 = vld [vmem:[#allocation5 + $0x150] sm:$0xff]  ;;  %v1287_v3 = vld [vmem:[#allocation5 + $0x148] sm:$0xff] }
  0x26   :  { %666 = vmatpush.bf16.msra.mxu2 %v1265_v18  ;;  %v1297_v60 = vld [vmem:[#allocation5 + $0x198] sm:$0xff]  ;;  %v1296_v0 = vld [vmem:[#allocation5 + $0x190] sm:$0xff]  ;;  %v1295_v5 = vld [vmem:[#allocation5 + $0x188] sm:$0xff] }
  0x27   :  { %679 = vmatpush.bf16.msra.mxu3 %v1273_v19  ;;  %v1305_v61 = vld [vmem:[#allocation5 + $0x1d8] sm:$0xff]  ;;  %v1304_v1 = vld [vmem:[#allocation5 + $0x1d0] sm:$0xff]  ;;  %v1303_v6 = vld [vmem:[#allocation5 + $0x1c8] sm:$0xff] }
  0x28   :  { %641 = vmatpush.bf16.msra.mxu0 %v1248_v20  ;;  %v90_v4 = vld [vmem:[#allocation2 + $0x10] sm:$0xff]  ;;  %v91_v7 = vld [vmem:[#allocation2 + $0x18] sm:$0xff]  ;;  %v1278_v10 = vld [vmem:[#allocation5 + $0x100] sm:$0xff] }
  0x29   :  { %654 = vmatpush.bf16.msra.mxu1 %v1256_v21  ;;  %v232_v8 = vunpack.c.l.b16 %v90_v4  ;;  %v233_v9 = vunpack.c.h.b16 %v90_v4  ;;  %v1286_v11 = vld [vmem:[#allocation5 + $0x140] sm:$0xff]  ;;  %v234_v12 = vunpack.c.l.b16 %v91_v7  ;;  %v235_v13 = vunpack.c.h.b16 %v91_v7  ;;  %v1317_v20 = vld [vmem:[#allocation7 + $0x38] sm:$0xff]  ;;  %v1316_v21 = vld [vmem:[#allocation7 + $0x30] sm:$0xff] }
  0x2a   :  { %667 = vmatpush.bf16.msra.mxu2 %v1264_v22  ;;  %v1294_v14 = vld [vmem:[#allocation5 + $0x180] sm:$0xff]  ;;  %v1315_v22 = vld [vmem:[#allocation7 + $0x28] sm:$0xff] }
  0x2b   :  { %680 = vmatpush.bf16.msra.mxu3 %v1272_v23  ;;  %v1302_v15 = vld [vmem:[#allocation5 + $0x1c0] sm:$0xff]  ;;  %v240_v16 = vpack.c.b16 %v232_v8, %v232_v8  ;;  %v241_v17 = vpack.c.b16 %v233_v9, %v233_v9  ;;  %v242_v18 = vpack.c.b16 %v234_v12, %v234_v12  ;;  %v243_v19 = vpack.c.b16 %v235_v13, %v235_v13  ;;  %v1311_v28 = vld [vmem:[#allocation7 + $0x8] sm:$0xff] }
  0x2c   :  { %642 = vmatpush.bf16.msra.mxu0 %v1247_v24  ;;  %v1314_v23 = vld [vmem:[#allocation7 + $0x20] sm:$0xff]  ;;  %v1313_v24 = vld [vmem:[#allocation7 + $0x18] sm:$0xff] }
  0x2d   :  { %655 = vmatpush.bf16.msra.mxu1 %v1255_v25  ;;  %v1310_v32 = vld [vmem:[#allocation7] sm:$0xff] }
  0x2e   :  { %668 = vmatpush.bf16.msra.mxu2 %v1263_v26  ;;  %v1312_v26 = vld [vmem:[#allocation7 + $0x10] sm:$0xff] }
  0x2f   :  { %681 = vmatpush.bf16.msra.mxu3 %v1271_v27 }
  0x30   :  { %643 = vmatpush.bf16.msra.mxu0 %v1246_v30 }
  0x31   :  { %656 = vmatpush.bf16.msra.mxu1 %v1254_v31 }
  0x32   :  { %669 = vmatpush.bf16.msra.mxu2 %v1262_v34  ;;  %v1333_v34 = vld [vmem:[%s1539_s4] ss:$0 sm:$0xff] }
  0x33   :  { %682 = vmatpush.bf16.msra.mxu3 %v1270_v35  ;;  %644 = vmatmul.bf16.vlgmr.msra.gmra.mxu0 %v236_v43  ;;  %v1325_v35 = vld [vmem:[#allocation8 + $0x38] sm:$0xff] }
  0x34   :  { %688 = vmatpush.bf16.msrb.mxu0 %v1285_v38  ;;  %657 = vmatmul.bf16.vlgmr.msra.gmra.mxu1 %v237_v45  ;;  %v1324_v38 = vld [vmem:[#allocation8 + $0x30] sm:$0xff] }
  0x35   :  { %701 = vmatpush.bf16.msrb.mxu1 %v1293_v39  ;;  %670 = vmatmul.bf16.vlgmr.msra.gmra.mxu2 %v238_v42  ;;  %v1322_v42 = vld [vmem:[#allocation8 + $0x20] sm:$0xff] }
  0x36   :  { %714 = vmatpush.bf16.msrb.mxu2 %v1301_v40  ;;  %683 = vmatmul.bf16.vlgmr.msra.gmra.mxu3 %v239_v44  ;;  %v1323_v40 = vld [vmem:[#allocation8 + $0x28] sm:$0xff]  ;;  %v1321_v44 = vld [vmem:[#allocation8 + $0x18] sm:$0xff] }
  0x37   :  { %727 = vmatpush.bf16.msrb.mxu3 %v1309_v41 }
  0x38   :  { %689 = vmatpush.bf16.msrb.mxu0 %v1284_v46 }
  0x39   :  { %702 = vmatpush.bf16.msrb.mxu1 %v1292_v47 }
  0x3a   :  { %715 = vmatpush.bf16.msrb.mxu2 %v1300_v48 }
  0x3b   :  { %728 = vmatpush.bf16.msrb.mxu3 %v1308_v49  ;;  %v1320_v49 = vld [vmem:[#allocation8 + $0x10] sm:$0xff] }
  0x3c   :  { %690 = vmatpush.bf16.msrb.mxu0 %v1283_v50 }
  0x3d   :  { %703 = vmatpush.bf16.msrb.mxu1 %v1291_v51 }
  0x3e   :  { %716 = vmatpush.bf16.msrb.mxu2 %v1299_v52 }
  0x3f   :  { %729 = vmatpush.bf16.msrb.mxu3 %v1307_v53 }
  0x40   :  { %691 = vmatpush.bf16.msrb.mxu0 %v1282_v54 }
  0x41   :  { %704 = vmatpush.bf16.msrb.mxu1 %v1290_v55 }
  0x42   :  { %717 = vmatpush.bf16.msrb.mxu2 %v1298_v56 }
  0x43   :  { %730 = vmatpush.bf16.msrb.mxu3 %v1306_v57 }
  0x44   :  { %692 = vmatpush.bf16.msrb.mxu0 %v1281_v58 }
  0x45   :  { %705 = vmatpush.bf16.msrb.mxu1 %v1289_v59 }
  0x46   :  { %718 = vmatpush.bf16.msrb.mxu2 %v1297_v60 }
  0x47   :  { %731 = vmatpush.bf16.msrb.mxu3 %v1305_v61  ;;  %v1319_v61 = vld [vmem:[#allocation8 + $0x8] sm:$0xff] }
  0x48   :  { %693 = vmatpush.bf16.msrb.mxu0 %v1280_v62  ;;  %v1318_v62 = vld [vmem:[#allocation8] sm:$0xff] }
  0x49   :  { %706 = vmatpush.bf16.msrb.mxu1 %v1288_v63  ;;  %v1334_v63 = vld [vmem:[%s1540_s5] ss:$0 sm:$0xff] }
  0x4a   :  { %719 = vmatpush.bf16.msrb.mxu2 %v1296_v0 }
  0x4b   :  { %732 = vmatpush.bf16.msrb.mxu3 %v1304_v1 }
  0x4c   :  { %694 = vmatpush.bf16.msrb.mxu0 %v1279_v2 }
  0x4d   :  { %707 = vmatpush.bf16.msrb.mxu1 %v1287_v3 }
  0x4e   :  { %720 = vmatpush.bf16.msrb.mxu2 %v1295_v5  ;;  %v1335_v5 = vld [vmem:[%s1541_s6] ss:$0 sm:$0xff] }
  0x4f   :  { %733 = vmatpush.bf16.msrb.mxu3 %v1303_v6 }
  0x50   :  { %695 = vmatpush.bf16.msrb.mxu0 %v1278_v10 }
  0x51   :  { %708 = vmatpush.bf16.msrb.mxu1 %v1286_v11 }
  0x52   :  { %721 = vmatpush.bf16.msrb.mxu2 %v1294_v14 }
  0x53   :  { %734 = vmatpush.bf16.msrb.mxu3 %v1302_v15  ;;  %696 = vmatmul.bf16.vlgmr.msrb.gmra.mxu0 %v240_v16 }
  0x54   :  { %709 = vmatmul.bf16.vlgmr.msrb.gmra.mxu1 %v241_v17  ;;  %810 = vmatpush.bf16.msra.mxu0 %v1317_v20 }
  0x55   :  { %722 = vmatmul.bf16.vlgmr.msrb.gmra.mxu2 %v242_v18  ;;  %893 = vmatpush.bf16.msra.mxu1 %v1325_v35 }
  0x56   :  { %735 = vmatmul.bf16.vlgmr.msrb.gmra.mxu3 %v243_v19 }
  0x58   :  { %811 = vmatpush.bf16.msra.mxu0 %v1316_v21 }
  0x59   :  { %894 = vmatpush.bf16.msra.mxu1 %v1324_v38 }
  0x5c   :  { %812 = vmatpush.bf16.msra.mxu0 %v1315_v22 }
  0x5d   :  { %895 = vmatpush.bf16.msra.mxu1 %v1323_v40 }
  0x60   :  { %813 = vmatpush.bf16.msra.mxu0 %v1314_v23 }
  0x61   :  { %896 = vmatpush.bf16.msra.mxu1 %v1322_v42 }
  0x64   :  { %814 = vmatpush.bf16.msra.mxu0 %v1313_v24 }
  0x65   :  { %897 = vmatpush.bf16.msra.mxu1 %v1321_v44 }
  0x68   :  { %815 = vmatpush.bf16.msra.mxu0 %v1312_v26 }
  0x69   :  { %898 = vmatpush.bf16.msra.mxu1 %v1320_v49 }
  0x6c   :  { %816 = vmatpush.bf16.msra.mxu0 %v1311_v28 }
  0x6d   :  { %899 = vmatpush.bf16.msra.mxu1 %v1319_v61 }
  0x70   :  { %817 = vmatpush.bf16.msra.mxu0 %v1310_v32 }
  0x71   :  { %900 = vmatpush.bf16.msra.mxu1 %v1318_v62 }
  0xb0   :  { %v645_v25 = vpop.f32.mrf.mxu0 }
  0xb1   :  { %v658_v27 = vpop.f32.mrf.mxu1  ;;  %v646_v39 = vadd.f32 %v1333_v34, %v645_v25 }
  0xb3   :  { %v659_v41 = vadd.f32 %v658_v27, %v646_v39 }
  0xb8   :  { %v671_v29 = vpop.f32.mrf.mxu2  ;;  %v647_v31 = vpop.f32.mrf.mxu0 }
  0xb9   :  { %v684_v30 = vpop.f32.mrf.mxu3  ;;  %v660_v33 = vpop.f32.mrf.mxu1  ;;  %v672_v43 = vadd.f32 %v671_v29, %v659_v41 }
  0xbb   :  { %v685_v45 = vadd.f32 %v684_v30, %v672_v43 }
  0xc0   :  { %v673_v36 = vpop.f32.mrf.mxu2 }
  0xc1   :  { %v686_v37 = vpop.f32.mrf.mxu3 }
  0xd0   :  { %v697_v46 = vpop.f32.mrf.mxu0 }
  0xd1   :  { %v710_v47 = vpop.f32.mrf.mxu1  ;;  %v698_v48 = vadd.f32 %v697_v46, %v685_v45 }
  0xd3   :  { %v711_v50 = vadd.f32 %v710_v47, %v698_v48 }
  0xd8   :  { %v723_v51 = vpop.f32.mrf.mxu2  ;;  %v699_v54 = vpop.f32.mrf.mxu0 }
  0xd9   :  { %v736_v52 = vpop.f32.mrf.mxu3  ;;  %v724_v53 = vadd.f32 %v723_v51, %v711_v50  ;;  %v712_v55 = vpop.f32.mrf.mxu1 }
  0xdb   :  { %v737_v56 = vadd.f32 %v736_v52, %v724_v53 }
  0xdd   :  { %v740_v57 = vmax.f32 %v737_v56, 0.0 }
  0xdf   :  { %v741_v58 = vpack.c.bf16 %v740_v57, %v740_v57 }
  0xe0   :  { %v725_v59 = vpop.f32.mrf.mxu2 }
  0xe1   :  { %v738_v60 = vpop.f32.mrf.mxu3  ;;  %818 = vmatmul.bf16.vlgmr.msra.gmra.mxu0 %v741_v58 }
 0x15e   :  { %v819_v0 = vpop.f32.mrf.mxu0 }
 0x15f   :  { %v820_v1 = vadd.f32 %v1334_v63, %v819_v0 }
 0x161   :  { %v823_v2 = vmax.f32 %v820_v1, 0.0 }
 0x163   :  { %v824_v3 = vpack.c.bf16 %v823_v2, %v823_v2 }
 0x165   :  { %901 = vmatmul.bf16.vlgmr.msra.gmra.mxu1 %v824_v3 }
 0x166   :  { %v821_v4 = vpop.f32.mrf.mxu0 }
 0x1e2   :  { %v902_v6 = vpop.f32.mrf.mxu1 }
 0x1e3   :  { %v903_v7 = vadd.f32 %v1335_v5, %v902_v6 }
 0x1e5   :  { %906 = vst [vmem:[#allocation10] sm:$0xff] %v903_v7 }
 0x1e6   :  { %917 = dma.vmem_to_hbm [thread:$0]  %s913_s25, 128, %s915_s28, [#allocation4]  }
 0x1ea   :  { %v904_v8 = vpop.f32.mrf.mxu1 }
 0x1eb   :  { %1462 = dma.done.wait [#allocation4], 128  }
 0x1ec   :  { %1463 = vsyncadd [#allocation4], 4294967168 }
 0x1ed   :  { %922 = vsyncpa [#allocation3], 1 }
 0x1ee   :  { %923 = vsyncpa [#allocation6], 1 }
 0x1ef   :  { %924 = vsyncpa [#allocation9], 1 }
 0x1f0   :  { %925 = vsyncpa [#allocation4], 1 }

// kernel: tpu_custom_call.1
= control target key start
LH: loop header
LB: loop body
LE: loop exit
PB: predicated region body
PF: predicated region fallthrough
CT: control target
= control target key end

     0   :  { %12 = vsyncpa [#allocation3], 0  ;;  %s1535_s0 = inlined_call_operand.hbm [shape: bf16[8,1024], index: 0, kind: input, shape index: {}]   ;;  %s1536_s1 = inlined_call_operand.hbm [shape: bf16[1024,128], index: 1, kind: input, shape index: {}]   ;;  %s1537_s2 = inlined_call_operand.hbm [shape: bf16[128,128], index: 2, kind: input, shape index: {}]   ;;  %s1538_s3 = inlined_call_operand.hbm [shape: bf16[128,128], index: 3, kind: input, shape index: {}]   ;;  %s1539_s4 = inlined_call_operand.vmem [shape: f32[1,128], index: 4, kind: input, shape index: {}]   ;;  %s1540_s5 = inlined_call_operand.vmem [shape: f32[1,128], index: 5, kind: input, shape index: {}]   ;;  %s1541_s6 = inlined_call_operand.vmem [shape: f32[1,128], index: 6, kind: input, shape index: {}]   ;;  %s1542_s7 = inlined_call_operand.hbm [shape: f32[8,128], index: 7, kind: output, shape index: {}]  }
   0x1   :  { %13 = vsyncpa [#allocation6], 0 }
   0x2   :  { %14 = vsyncpa [#allocation9], 0  ;;  %s31_s26 = sshll.u32 %s1536_s1, 4  ;;  %s32_s26 = int_to_ptr.hbm [resolvable:$true] %s31_s26 }
   0x3   :  { %15 = vsyncpa [#allocation4], 0  ;;  %s1464_s27 = smov [#allocation5]   ;;  %s21_s8 = sshll.u32 %s1535_s0, 4  ;;  %s22_s8 = int_to_ptr.hbm [resolvable:$true] %s21_s8 }
   0x4   :  { %s33_s28 = sshll.u32 %s1464_s27, 4  ;;  %s1465_s9 = smov 64   ;;  %s34_s28 = int_to_ptr.vmem [resolvable:$true] %s33_s28 }
   0x5   :  { %s1466_s10 = smov 4   ;;  %s1467_s11 = smov [#allocation2]  }
   0x6   :  { %39 = dma.hbm_to_vmem [thread:$0]  %s32_s26, 8192, %s34_s28, [#allocation6], %s1465_s9, %s1465_s9, %s1466_s10  }
   0x7   :  { %s23_s12 = sshll.u32 %s1467_s11, 4  ;;  %s44_s15 = sshll.u32 %s1537_s2, 4  ;;  %s24_s12 = int_to_ptr.vmem [resolvable:$true] %s23_s12  ;;  %s45_s15 = int_to_ptr.hbm [resolvable:$true] %s44_s15 }
   0x8   :  { %26 = dma.hbm_to_vmem [thread:$0]  %s22_s8, 512, %s24_s12, [#allocation3]  }
   0x9   :  { %s57_s17 = sshll.u32 %s1538_s3, 4  ;;  %s1468_s18 = smov [#allocation7]   ;;  %s58_s17 = int_to_ptr.hbm [resolvable:$true] %s57_s17 }
   0xa   :  { %s46_s19 = sshll.u32 %s1468_s18, 4  ;;  %s1469_s0 = smov [#allocation8]   ;;  %s47_s19 = int_to_ptr.vmem [resolvable:$true] %s46_s19 }
   0xb   :  { %52 = dma.hbm_to_vmem [thread:$0]  %s45_s15, 1024, %s47_s19, [#allocation6], %s1465_s9, %s1465_s9, %s1466_s10  }
   0xc   :  { %s59_s20 = sshll.u32 %s1469_s0, 4  ;;  %s60_s20 = int_to_ptr.vmem [resolvable:$true] %s59_s20 }
   0xd   :  { %65 = dma.hbm_to_vmem [thread:$0]  %s58_s17, 1024, %s60_s20, [#allocation9], %s1465_s9, %s1465_s9, %s1466_s10  }
   0xe   :  { %1456 = dma.done.wait [#allocation3], 512  }
   0xf   :  { %1457 = vsyncadd [#allocation3], 4294966784 }
  0x10   :  { %1458 = dma.done.wait [#allocation6], 9216  }
  0x11   :  { %1459 = vsyncadd [#allocation6], 4294958080 }
  0x12   :  { %1460 = dma.done.wait [#allocation9], 1024  }
  0x13   :  { %1461 = vsyncadd [#allocation9], 4294966272  ;;  %v1253_v0 = vld [vmem:[#allocation5 + $0x38] sm:$0xff]  ;;  %v1252_v4 = vld [vmem:[#allocation5 + $0x30] sm:$0xff]  ;;  %s1470_s24 = smov [#allocation10]   ;;  %s914_s28 = sshll.u32 %s1542_s7, 4  ;;  %s915_s28 = int_to_ptr.hbm [resolvable:$true] %s914_s28 }
  0x14   :  { %v1261_v1 = vld [vmem:[#allocation5 + $0x78] sm:$0xff]  ;;  %636 = vmatpush.bf16.msra.mxu0 %v1253_v0  ;;  %v1260_v5 = vld [vmem:[#allocation5 + $0x70] sm:$0xff]  ;;  %v1251_v8 = vld [vmem:[#allocation5 + $0x28] sm:$0xff]  ;;  %s912_s25 = sshll.u32 %s1470_s24, 4  ;;  %s913_s25 = int_to_ptr.vmem [resolvable:$true] %s912_s25 }
  0x15   :  { %v1269_v2 = vld [vmem:[#allocation5 + $0xb8] sm:$0xff]  ;;  %649 = vmatpush.bf16.msra.mxu1 %v1261_v1  ;;  %v1268_v6 = vld [vmem:[#allocation5 + $0xb0] sm:$0xff]  ;;  %v1259_v9 = vld [vmem:[#allocation5 + $0x68] sm:$0xff] }
  0x16   :  { %v1277_v3 = vld [vmem:[#allocation5 + $0xf8] sm:$0xff]  ;;  %662 = vmatpush.bf16.msra.mxu2 %v1269_v2  ;;  %v1276_v7 = vld [vmem:[#allocation5 + $0xf0] sm:$0xff]  ;;  %v1267_v10 = vld [vmem:[#allocation5 + $0xa8] sm:$0xff] }
  0x17   :  { %675 = vmatpush.bf16.msra.mxu3 %v1277_v3  ;;  %v1275_v11 = vld [vmem:[#allocation5 + $0xe8] sm:$0xff]  ;;  %v1250_v12 = vld [vmem:[#allocation5 + $0x20] sm:$0xff]  ;;  %v1249_v16 = vld [vmem:[#allocation5 + $0x18] sm:$0xff] }
  0x18   :  { %637 = vmatpush.bf16.msra.mxu0 %v1252_v4  ;;  %v1258_v13 = vld [vmem:[#allocation5 + $0x60] sm:$0xff]  ;;  %v1257_v17 = vld [vmem:[#allocation5 + $0x58] sm:$0xff]  ;;  %v1248_v20 = vld [vmem:[#allocation5 + $0x10] sm:$0xff] }
  0x19   :  { %650 = vmatpush.bf16.msra.mxu1 %v1260_v5  ;;  %v1266_v14 = vld [vmem:[#allocation5 + $0xa0] sm:$0xff]  ;;  %v1265_v18 = vld [vmem:[#allocation5 + $0x98] sm:$0xff]  ;;  %v1256_v21 = vld [vmem:[#allocation5 + $0x50] sm:$0xff] }
  0x1a   :  { %663 = vmatpush.bf16.msra.mxu2 %v1268_v6  ;;  %v1274_v15 = vld [vmem:[#allocation5 + $0xe0] sm:$0xff]  ;;  %v1273_v19 = vld [vmem:[#allocation5 + $0xd8] sm:$0xff]  ;;  %v1264_v22 = vld [vmem:[#allocation5 + $0x90] sm:$0xff] }
  0x1b   :  { %676 = vmatpush.bf16.msra.mxu3 %v1276_v7  ;;  %v1272_v23 = vld [vmem:[#allocation5 + $0xd0] sm:$0xff]  ;;  %v1247_v24 = vld [vmem:[#allocation5 + $0x8] sm:$0xff]  ;;  %v88_v29 = vld [vmem:[#allocation2] sm:$0xff] }
  0x1c   :  { %638 = vmatpush.bf16.msra.mxu0 %v1251_v8  ;;  %v1255_v25 = vld [vmem:[#allocation5 + $0x48] sm:$0xff]  ;;  %v1246_v30 = vld [vmem:[#allocation5] sm:$0xff]  ;;  %v228_v33 = vunpack.c.l.b16 %v88_v29  ;;  %v229_v37 = vunpack.c.h.b16 %v88_v29  ;;  %v1285_v38 = vld [vmem:[#allocation5 + $0x138] sm:$0xff] }
  0x1d   :  { %651 = vmatpush.bf16.msra.mxu1 %v1259_v9  ;;  %v1263_v26 = vld [vmem:[#allocation5 + $0x88] sm:$0xff]  ;;  %v1254_v31 = vld [vmem:[#allocation5 + $0x40] sm:$0xff]  ;;  %v1293_v39 = vld [vmem:[#allocation5 + $0x178] sm:$0xff] }
  0x1e   :  { %664 = vmatpush.bf16.msra.mxu2 %v1267_v10  ;;  %v1271_v27 = vld [vmem:[#allocation5 + $0xc8] sm:$0xff]  ;;  %v1262_v34 = vld [vmem:[#allocation5 + $0x80] sm:$0xff]  ;;  %v1301_v40 = vld [vmem:[#allocation5 + $0x1b8] sm:$0xff]  ;;  %v236_v43 = vpack.c.b16 %v228_v33, %v228_v33  ;;  %v237_v45 = vpack.c.b16 %v229_v37, %v229_v37 }
  0x1f   :  { %677 = vmatpush.bf16.msra.mxu3 %v1275_v11  ;;  %v89_v28 = vld [vmem:[#allocation2 + $0x8] sm:$0xff]  ;;  %v1270_v35 = vld [vmem:[#allocation5 + $0xc0] sm:$0xff]  ;;  %v1309_v41 = vld [vmem:[#allocation5 + $0x1f8] sm:$0xff] }
  0x20   :  { %639 = vmatpush.bf16.msra.mxu0 %v1250_v12  ;;  %v230_v32 = vunpack.c.l.b16 %v89_v28  ;;  %v231_v36 = vunpack.c.h.b16 %v89_v28  ;;  %v1284_v46 = vld [vmem:[#allocation5 + $0x130] sm:$0xff]  ;;  %v1283_v50 = vld [vmem:[#allocation5 + $0x128] sm:$0xff]  ;;  %v1282_v54 = vld [vmem:[#allocation5 + $0x120] sm:$0xff] }
  0x21   :  { %652 = vmatpush.bf16.msra.mxu1 %v1258_v13  ;;  %v1292_v47 = vld [vmem:[#allocation5 + $0x170] sm:$0xff]  ;;  %v1291_v51 = vld [vmem:[#allocation5 + $0x168] sm:$0xff]  ;;  %v1290_v55 = vld [vmem:[#allocation5 + $0x160] sm:$0xff] }
  0x22   :  { %665 = vmatpush.bf16.msra.mxu2 %v1266_v14  ;;  %v238_v42 = vpack.c.b16 %v230_v32, %v230_v32  ;;  %v239_v44 = vpack.c.b16 %v231_v36, %v231_v36  ;;  %v1300_v48 = vld [vmem:[#allocation5 + $0x1b0] sm:$0xff]  ;;  %v1299_v52 = vld [vmem:[#allocation5 + $0x1a8] sm:$0xff]  ;;  %v1298_v56 = vld [vmem:[#allocation5 + $0x1a0] sm:$0xff] }
  0x23   :  { %678 = vmatpush.bf16.msra.mxu3 %v1274_v15  ;;  %v1308_v49 = vld [vmem:[#allocation5 + $0x1f0] sm:$0xff]  ;;  %v1307_v53 = vld [vmem:[#allocation5 + $0x1e8] sm:$0xff]  ;;  %v1306_v57 = vld [vmem:[#allocation5 + $0x1e0] sm:$0xff] }
  0x24   :  { %640 = vmatpush.bf16.msra.mxu0 %v1249_v16  ;;  %v1281_v58 = vld [vmem:[#allocation5 + $0x118] sm:$0xff]  ;;  %v1280_v62 = vld [vmem:[#allocation5 + $0x110] sm:$0xff]  ;;  %v1279_v2 = vld [vmem:[#allocation5 + $0x108] sm:$0xff] }
  0x25   :  { %653 = vmatpush.bf16.msra.mxu1 %v1257_v17  ;;  %v1289_v59 = vld [vmem:[#allocation5 + $0x158] sm:$0xff]  ;;  %v1288_v63 = vld [vmem:[#allocation5 + $0x150] sm:$0xff]  ;;  %v1287_v3 = vld [vmem:[#allocation5 + $0x148] sm:$0xff] }
  0x26   :  { %666 = vmatpush.bf16.msra.mxu2 %v1265_v18  ;;  %v1297_v60 = vld [vmem:[#allocation5 + $0x198] sm:$0xff]  ;;  %v1296_v0 = vld [vmem:[#allocation5 + $0x190] sm:$0xff]  ;;  %v1295_v5 = vld [vmem:[#allocation5 + $0x188] sm:$0xff] }
  0x27   :  { %679 = vmatpush.bf16.msra.mxu3 %v1273_v19  ;;  %v1305_v61 = vld [vmem:[#allocation5 + $0x1d8] sm:$0xff]  ;;  %v1304_v1 = vld [vmem:[#allocation5 + $0x1d0] sm:$0xff]  ;;  %v1303_v6 = vld [vmem:[#allocation5 + $0x1c8] sm:$0xff] }
  0x28   :  { %641 = vmatpush.bf16.msra.mxu0 %v1248_v20  ;;  %v90_v4 = vld [vmem:[#allocation2 + $0x10] sm:$0xff]  ;;  %v91_v7 = vld [vmem:[#allocation2 + $0x18] sm:$0xff]  ;;  %v1278_v10 = vld [vmem:[#allocation5 + $0x100] sm:$0xff] }
  0x29   :  { %654 = vmatpush.bf16.msra.mxu1 %v1256_v21  ;;  %v232_v8 = vunpack.c.l.b16 %v90_v4  ;;  %v233_v9 = vunpack.c.h.b16 %v90_v4  ;;  %v1286_v11 = vld [vmem:[#allocation5 + $0x140] sm:$0xff]  ;;  %v234_v12 = vunpack.c.l.b16 %v91_v7  ;;  %v235_v13 = vunpack.c.h.b16 %v91_v7  ;;  %v1317_v20 = vld [vmem:[#allocation7 + $0x38] sm:$0xff]  ;;  %v1316_v21 = vld [vmem:[#allocation7 + $0x30] sm:$0xff] }
  0x2a   :  { %667 = vmatpush.bf16.msra.mxu2 %v1264_v22  ;;  %v1294_v14 = vld [vmem:[#allocation5 + $0x180] sm:$0xff]  ;;  %v1315_v22 = vld [vmem:[#allocation7 + $0x28] sm:$0xff] }
  0x2b   :  { %680 = vmatpush.bf16.msra.mxu3 %v1272_v23  ;;  %v1302_v15 = vld [vmem:[#allocation5 + $0x1c0] sm:$0xff]  ;;  %v240_v16 = vpack.c.b16 %v232_v8, %v232_v8  ;;  %v241_v17 = vpack.c.b16 %v233_v9, %v233_v9  ;;  %v242_v18 = vpack.c.b16 %v234_v12, %v234_v12  ;;  %v243_v19 = vpack.c.b16 %v235_v13, %v235_v13  ;;  %v1311_v28 = vld [vmem:[#allocation7 + $0x8] sm:$0xff] }
  0x2c   :  { %642 = vmatpush.bf16.msra.mxu0 %v1247_v24  ;;  %v1314_v23 = vld [vmem:[#allocation7 + $0x20] sm:$0xff]  ;;  %v1313_v24 = vld [vmem:[#allocation7 + $0x18] sm:$0xff] }
  0x2d   :  { %655 = vmatpush.bf16.msra.mxu1 %v1255_v25  ;;  %v1310_v32 = vld [vmem:[#allocation7] sm:$0xff] }
  0x2e   :  { %668 = vmatpush.bf16.msra.mxu2 %v1263_v26  ;;  %v1312_v26 = vld [vmem:[#allocation7 + $0x10] sm:$0xff] }
  0x2f   :  { %681 = vmatpush.bf16.msra.mxu3 %v1271_v27 }
  0x30   :  { %643 = vmatpush.bf16.msra.mxu0 %v1246_v30 }
  0x31   :  { %656 = vmatpush.bf16.msra.mxu1 %v1254_v31 }
  0x32   :  { %669 = vmatpush.bf16.msra.mxu2 %v1262_v34  ;;  %v1333_v34 = vld [vmem:[%s1539_s4] ss:$0 sm:$0xff] }
  0x33   :  { %682 = vmatpush.bf16.msra.mxu3 %v1270_v35  ;;  %644 = vmatmul.bf16.vlgmr.msra.gmra.mxu0 %v236_v43  ;;  %v1325_v35 = vld [vmem:[#allocation8 + $0x38] sm:$0xff] }
  0x34   :  { %688 = vmatpush.bf16.msrb.mxu0 %v1285_v38  ;;  %657 = vmatmul.bf16.vlgmr.msra.gmra.mxu1 %v237_v45  ;;  %v1324_v38 = vld [vmem:[#allocation8 + $0x30] sm:$0xff] }
  0x35   :  { %701 = vmatpush.bf16.msrb.mxu1 %v1293_v39  ;;  %670 = vmatmul.bf16.vlgmr.msra.gmra.mxu2 %v238_v42  ;;  %v1322_v42 = vld [vmem:[#allocation8 + $0x20] sm:$0xff] }
  0x36   :  { %714 = vmatpush.bf16.msrb.mxu2 %v1301_v40  ;;  %683 = vmatmul.bf16.vlgmr.msra.gmra.mxu3 %v239_v44  ;;  %v1323_v40 = vld [vmem:[#allocation8 + $0x28] sm:$0xff]  ;;  %v1321_v44 = vld [vmem:[#allocation8 + $0x18] sm:$0xff] }
  0x37   :  { %727 = vmatpush.bf16.msrb.mxu3 %v1309_v41 }
  0x38   :  { %689 = vmatpush.bf16.msrb.mxu0 %v1284_v46 }
  0x39   :  { %702 = vmatpush.bf16.msrb.mxu1 %v1292_v47 }
  0x3a   :  { %715 = vmatpush.bf16.msrb.mxu2 %v1300_v48 }
  0x3b   :  { %728 = vmatpush.bf16.msrb.mxu3 %v1308_v49  ;;  %v1320_v49 = vld [vmem:[#allocation8 + $0x10] sm:$0xff] }
  0x3c   :  { %690 = vmatpush.bf16.msrb.mxu0 %v1283_v50 }
  0x3d   :  { %703 = vmatpush.bf16.msrb.mxu1 %v1291_v51 }
  0x3e   :  { %716 = vmatpush.bf16.msrb.mxu2 %v1299_v52 }
  0x3f   :  { %729 = vmatpush.bf16.msrb.mxu3 %v1307_v53 }
  0x40   :  { %691 = vmatpush.bf16.msrb.mxu0 %v1282_v54 }
  0x41   :  { %704 = vmatpush.bf16.msrb.mxu1 %v1290_v55 }
  0x42   :  { %717 = vmatpush.bf16.msrb.mxu2 %v1298_v56 }
  0x43   :  { %730 = vmatpush.bf16.msrb.mxu3 %v1306_v57 }
  0x44   :  { %692 = vmatpush.bf16.msrb.mxu0 %v1281_v58 }
  0x45   :  { %705 = vmatpush.bf16.msrb.mxu1 %v1289_v59 }
  0x46   :  { %718 = vmatpush.bf16.msrb.mxu2 %v1297_v60 }
  0x47   :  { %731 = vmatpush.bf16.msrb.mxu3 %v1305_v61  ;;  %v1319_v61 = vld [vmem:[#allocation8 + $0x8] sm:$0xff] }
  0x48   :  { %693 = vmatpush.bf16.msrb.mxu0 %v1280_v62  ;;  %v1318_v62 = vld [vmem:[#allocation8] sm:$0xff] }
  0x49   :  { %706 = vmatpush.bf16.msrb.mxu1 %v1288_v63  ;;  %v1334_v63 = vld [vmem:[%s1540_s5] ss:$0 sm:$0xff] }
  0x4a   :  { %719 = vmatpush.bf16.msrb.mxu2 %v1296_v0 }
  0x4b   :  { %732 = vmatpush.bf16.msrb.mxu3 %v1304_v1 }
  0x4c   :  { %694 = vmatpush.bf16.msrb.mxu0 %v1279_v2 }
  0x4d   :  { %707 = vmatpush.bf16.msrb.mxu1 %v1287_v3 }
  0x4e   :  { %720 = vmatpush.bf16.msrb.mxu2 %v1295_v5  ;;  %v1335_v5 = vld [vmem:[%s1541_s6] ss:$0 sm:$0xff] }
  0x4f   :  { %733 = vmatpush.bf16.msrb.mxu3 %v1303_v6 }
  0x50   :  { %695 = vmatpush.bf16.msrb.mxu0 %v1278_v10 }
  0x51   :  { %708 = vmatpush.bf16.msrb.mxu1 %v1286_v11 }
  0x52   :  { %721 = vmatpush.bf16.msrb.mxu2 %v1294_v14 }
  0x53   :  { %734 = vmatpush.bf16.msrb.mxu3 %v1302_v15  ;;  %696 = vmatmul.bf16.vlgmr.msrb.gmra.mxu0 %v240_v16 }
  0x54   :  { %709 = vmatmul.bf16.vlgmr.msrb.gmra.mxu1 %v241_v17  ;;  %810 = vmatpush.bf16.msra.mxu0 %v1317_v20 }
  0x55   :  { %722 = vmatmul.bf16.vlgmr.msrb.gmra.mxu2 %v242_v18  ;;  %893 = vmatpush.bf16.msra.mxu1 %v1325_v35 }
  0x56   :  { %735 = vmatmul.bf16.vlgmr.msrb.gmra.mxu3 %v243_v19 }
  0x58   :  { %811 = vmatpush.bf16.msra.mxu0 %v1316_v21 }
  0x59   :  { %894 = vmatpush.bf16.msra.mxu1 %v1324_v38 }
  0x5c   :  { %812 = vmatpush.bf16.msra.mxu0 %v1315_v22 }
  0x5d   :  { %895 = vmatpush.bf16.msra.mxu1 %v1323_v40 }
  0x60   :  { %813 = vmatpush.bf16.msra.mxu0 %v1314_v23 }
  0x61   :  { %896 = vmatpush.bf16.msra.mxu1 %v1322_v42 }
  0x64   :  { %814 = vmatpush.bf16.msra.mxu0 %v1313_v24 }
  0x65   :  { %897 = vmatpush.bf16.msra.mxu1 %v1321_v44 }
  0x68   :  { %815 = vmatpush.bf16.msra.mxu0 %v1312_v26 }
  0x69   :  { %898 = vmatpush.bf16.msra.mxu1 %v1320_v49 }
  0x6c   :  { %816 = vmatpush.bf16.msra.mxu0 %v1311_v28 }
  0x6d   :  { %899 = vmatpush.bf16.msra.mxu1 %v1319_v61 }
  0x70   :  { %817 = vmatpush.bf16.msra.mxu0 %v1310_v32 }
  0x71   :  { %900 = vmatpush.bf16.msra.mxu1 %v1318_v62 }
  0xb0   :  { %v645_v25 = vpop.f32.mrf.mxu0 }
  0xb1   :  { %v658_v27 = vpop.f32.mrf.mxu1  ;;  %v646_v39 = vadd.f32 %v1333_v34, %v645_v25 }
  0xb3   :  { %v659_v41 = vadd.f32 %v658_v27, %v646_v39 }
  0xb8   :  { %v671_v29 = vpop.f32.mrf.mxu2  ;;  %v647_v31 = vpop.f32.mrf.mxu0 }
  0xb9   :  { %v684_v30 = vpop.f32.mrf.mxu3  ;;  %v660_v33 = vpop.f32.mrf.mxu1  ;;  %v672_v43 = vadd.f32 %v671_v29, %v659_v41 }
  0xbb   :  { %v685_v45 = vadd.f32 %v684_v30, %v672_v43 }
  0xc0   :  { %v673_v36 = vpop.f32.mrf.mxu2 }
  0xc1   :  { %v686_v37 = vpop.f32.mrf.mxu3 }
  0xd0   :  { %v697_v46 = vpop.f32.mrf.mxu0 }
  0xd1   :  { %v710_v47 = vpop.f32.mrf.mxu1  ;;  %v698_v48 = vadd.f32 %v697_v46, %v685_v45 }
  0xd3   :  { %v711_v50 = vadd.f32 %v710_v47, %v698_v48 }
  0xd8   :  { %v723_v51 = vpop.f32.mrf.mxu2  ;;  %v699_v54 = vpop.f32.mrf.mxu0 }
  0xd9   :  { %v736_v52 = vpop.f32.mrf.mxu3  ;;  %v724_v53 = vadd.f32 %v723_v51, %v711_v50  ;;  %v712_v55 = vpop.f32.mrf.mxu1 }
  0xdb   :  { %v737_v56 = vadd.f32 %v736_v52, %v724_v53 }
  0xdd   :  { %v740_v57 = vmax.f32 %v737_v56, 0.0 }
  0xdf   :  { %v741_v58 = vpack.c.bf16 %v740_v57, %v740_v57 }
  0xe0   :  { %v725_v59 = vpop.f32.mrf.mxu2 }
  0xe1   :  { %v738_v60 = vpop.f32.mrf.mxu3  ;;  %818 = vmatmul.bf16.vlgmr.msra.gmra.mxu0 %v741_v58 }
 0x15e   :  { %v819_v0 = vpop.f32.mrf.mxu0 }
 0x15f   :  { %v820_v1 = vadd.f32 %v1334_v63, %v819_v0 }
 0x161   :  { %v823_v2 = vmax.f32 %v820_v1, 0.0 }
 0x163   :  { %v824_v3 = vpack.c.bf16 %v823_v2, %v823_v2 }
 0x165   :  { %901 = vmatmul.bf16.vlgmr.msra.gmra.mxu1 %v824_v3 }
 0x166   :  { %v821_v4 = vpop.f32.mrf.mxu0 }
 0x1e2   :  { %v902_v6 = vpop.f32.mrf.mxu1 }
 0x1e3   :  { %v903_v7 = vadd.f32 %v1335_v5, %v902_v6 }
 0x1e5   :  { %906 = vst [vmem:[#allocation10] sm:$0xff] %v903_v7 }
 0x1e6   :  { %917 = dma.vmem_to_hbm [thread:$0]  %s913_s25, 128, %s915_s28, [#allocation4]  }
 0x1ea   :  { %v904_v8 = vpop.f32.mrf.mxu1 }
 0x1eb   :  { %1462 = dma.done.wait [#allocation4], 128  }
 0x1ec   :  { %1463 = vsyncadd [#allocation4], 4294967168 }
 0x1ed   :  { %922 = vsyncpa [#allocation3], 1 }
 0x1ee   :  { %923 = vsyncpa [#allocation6], 1 }
 0x1ef   :  { %924 = vsyncpa [#allocation9], 1 }
 0x1f0   :  { %925 = vsyncpa [#allocation4], 1 }

</bundles_post_ra>
